<compile_context>
chip_gen: v7x
topology: tpu7x:2x2x1
jax: 0.10.0
libtpu: 0.0.40
codegen_flags: <defaults>
</compile_context>

<pallas_src>
import math
from functools import partial

import numpy as np
import jax
import jax.numpy as jnp
from jax import lax
from jax.experimental import pallas as pl
from jax.experimental.pallas import tpu as pltpu


# ---------------------------------------------------------------------------
# Shared elementwise tail (gates, h~, c, h_next) -- all f32 math on the VPU/EUP.
# ---------------------------------------------------------------------------
def _gates_and_outputs(H, xp, h_f32, pre5, whhT, mm_dtype, prec):
    # One sigmoid over the lane-dense (B, 4H) slab, then slice the gates.
    s4 = jax.nn.sigmoid(pre5[:, 0:4 * H])
    z = s4[:, 0 * H:1 * H]
    i = s4[:, 1 * H:2 * H]          # uses bias_z (module quirk), see prepare_gr_a_weights
    r = s4[:, 2 * H:3 * H]
    o = s4[:, 3 * H:4 * H]

    # h~ = tanh( [x'/g fused part] + (r*h) @ Whh.T )  (depends on r -> separate matmul)
    phh = jnp.dot((r * h_f32).astype(mm_dtype), whhT,
                  precision=prec, preferred_element_type=jnp.float32)
    h_tilde = jnp.tanh(pre5[:, 4 * H:5 * H] + phh)

    c = (1.0 - z) * xp + z * h_tilde + i * h_f32
    h_next = o * jnp.tanh(c)
    return h_next, c


def _dot_precision(mm_dtype):
    # Full-precision MXU passes when operands are f32; standard path for bf16.
    return (lax.Precision.HIGHEST if jnp.dtype(mm_dtype) == jnp.dtype(jnp.float32)
            else lax.Precision.DEFAULT)


# ---------------------------------------------------------------------------
# Single-step kernel.
# ---------------------------------------------------------------------------
def _gr_a_step_kernel(I, H, x_ref, hg_ref, a_ref, wx5_ref, whg5_ref, whhT_ref,
                      b5_ref, out_ref):
    mm = wx5_ref.dtype                         # MXU operand dtype (bf16 default)
    prec = _dot_precision(mm)

    hg_f32 = hg_ref[...]                       # (B, 2H) f32, packed [h | g] by wrapper
    h_f32 = hg_f32[:, 0:H]

    # x' = F.linear(x, a) = x @ a.T   (transpose done in-kernel on the small tile)
    # TODO(synk): for latency-critical use, fold `a` into the weights as
    # [a.T | a.T @ W_x5] so xp and its pre-activation come from a single matmul.
    aT = a_ref[...].T.astype(mm)
    xp = jnp.dot(x_ref[...].astype(mm), aT,
                 precision=prec, preferred_element_type=jnp.float32)       # (B, I) f32

    # pre5[:, :4H] = z,i,r,o pre-activations; pre5[:, 4H:] = x'/g part of h~.
    # The hg matmul is independent of xp -> the two MXU ops pipeline back-to-back.
    pre5 = (jnp.dot(hg_f32.astype(mm), whg5_ref[...],
                    precision=prec, preferred_element_type=jnp.float32)
            + jnp.dot(xp.astype(mm), wx5_ref[...],
                      precision=prec, preferred_element_type=jnp.float32)
            + b5_ref[...])                                                  # (B, 5H) f32

    h_next, c = _gates_and_outputs(H, xp, h_f32, pre5, whhT_ref[...], mm, prec)

    # Single (B, 2H) output slab [h_next | c]; split in the wrapper.
    out_ref[:, 0:H] = h_next.astype(out_ref.dtype)
    out_ref[:, H:2 * H] = c.astype(out_ref.dtype)


# ---------------------------------------------------------------------------
# Sequence kernel: grid=(T,) "arbitrary"; weights VMEM-resident; h carried in scratch.
# ---------------------------------------------------------------------------
def _gr_a_seq_kernel(I, H, x_ref, a_ref, g_ref, h0_ref, wx5_ref, whg5_ref,
                     whhT_ref, b5_ref, out_ref, h_f32_ref, hg_mm_ref):
    t = pl.program_id(0)
    mm = wx5_ref.dtype
    prec = _dot_precision(mm)

    @pl.when(t == 0)
    def _():
        h0 = h0_ref[...]
        h_f32_ref[...] = h0
        hg_mm_ref[:, 0:H] = h0.astype(mm)

    # Pack this step's g next to the carried h in the persistent [h | g] MXU slab.
    # (Just an input copy -- it does not serialize against any MXU result.)
    hg_mm_ref[:, H:2 * H] = g_ref[...].astype(mm)

    h_f32 = h_f32_ref[...]

    aT = a_ref[...].T.astype(mm)
    xp = jnp.dot(x_ref[...].astype(mm), aT,
                 precision=prec, preferred_element_type=jnp.float32)

    pre5 = (jnp.dot(hg_mm_ref[...], whg5_ref[...],
                    precision=prec, preferred_element_type=jnp.float32)
            + jnp.dot(xp.astype(mm), wx5_ref[...],
                      precision=prec, preferred_element_type=jnp.float32)
            + b5_ref[...])

    h_next, c = _gates_and_outputs(H, xp, h_f32, pre5, whhT_ref[...], mm, prec)

    out_ref[:, 0:H] = h_next.astype(out_ref.dtype)
    out_ref[:, H:2 * H] = c.astype(out_ref.dtype)

    # Carry h to the next step (f32 for the elementwise math, mm-dtype for the MXU).
    h_f32_ref[...] = h_next
    hg_mm_ref[:, 0:H] = h_next.astype(mm)


# ---------------------------------------------------------------------------
# One-time weight preprocessing (hoisted out of the per-step call).
# ---------------------------------------------------------------------------
def prepare_gr_a_weights(params, input_size, hidden_size, matmul_dtype=jnp.bfloat16):
    """Builds:
      W_x5  (I, 5H)  : x' contribution to [pre_z | pre_i | pre_r | pre_o | pre_h~]
      W_hg5 (2H, 5H) : [h | g] contribution (h-rows of the h~ block are zero --
                       h~ has no plain-h term, only r*h via weight_hh)
      WhhT  (H, H), b5 (1, 5H) with bias_z reused for the i gate (module quirk).
    """
    I, H = input_size, hidden_size
    zeros_hh = jnp.zeros((H, H), params["weight_hz"].dtype)

    wx5 = jnp.concatenate([params["weight_xz"], params["weight_xi"], params["weight_xr"],
                           params["weight_xo"], params["weight_xh"]], axis=0).T   # (I, 5H)
    wh5 = jnp.concatenate([params["weight_hz"], params["weight_hi"], params["weight_hr"],
                           params["weight_ho"], zeros_hh], axis=0).T              # (H, 5H)
    wg5 = jnp.concatenate([params["weight_gz"], params["weight_gi"], params["weight_gr"],
                           params["weight_go"], params["weight_gh"]], axis=0).T   # (H, 5H)
    whg5 = jnp.concatenate([wh5, wg5], axis=0)                                     # (2H, 5H)

    # bias_z is intentionally reused for the i gate (matches the PyTorch forward).
    b5 = jnp.concatenate([params["bias_z"], params["bias_z"], params["bias_r"],
                          params["bias_o"], params["bias_h"]], axis=0)
    b5 = b5.reshape(1, 5 * H).astype(jnp.float32)

    return {"w_x5": wx5.astype(matmul_dtype),
            "w_hg5": whg5.astype(matmul_dtype),
            "whhT": params["weight_hh"].T.astype(matmul_dtype),
            "b5": b5}


def _vmem_limit_bytes(arrays, scratch_bytes=0):
    """Conservative scoped-VMEM budget: 2x (double-buffer) operands + scratch + slack."""
    total = sum(math.prod(shape) * np.dtype(dtype).itemsize for shape, dtype in arrays)
    return int(min(max(2 * total + scratch_bytes + (1 << 20), 4 << 20), 128 << 20))


# ---------------------------------------------------------------------------
# Wrappers.
# ---------------------------------------------------------------------------
def gr_a_forward(x, h, a, g, prepped):
    """Single fused GR_A step.  x:(B,I), h:(B,H), a:(I,I), g:(B,H) -> (h_next, c)."""
    B, I = x.shape
    H = h.shape[1]
    assert I == H, "GR_A requires input_size == hidden_size (see the c-mix in forward)."

    mm = prepped["w_x5"].dtype
    hg = jnp.concatenate([h, g], axis=1).astype(jnp.float32)      # pack [h | g] once

    vmem = pl.BlockSpec(memory_space=pltpu.MemorySpace.VMEM)
    operands = [((B, I), jnp.float32), ((B, 2 * H), jnp.float32), ((I, I), jnp.float32),
                ((I, 5 * H), mm), ((2 * H, 5 * H), mm), ((H, H), mm),
                ((1, 5 * H), jnp.float32), ((B, 2 * H), jnp.float32)]

    out = pl.pallas_call(
        partial(_gr_a_step_kernel, I, H),
        out_shape=jax.ShapeDtypeStruct((B, 2 * H), jnp.float32),
        in_specs=[vmem] * 7,
        out_specs=vmem,
        compiler_params=pltpu.CompilerParams(
            vmem_limit_bytes=_vmem_limit_bytes(operands)),
    )(x, hg, a, prepped["w_x5"], prepped["w_hg5"], prepped["whhT"], prepped["b5"])

    return out[:, :H], out[:, H:]


def gr_a_sequence(xs, h0, a_seq, g_seq, prepped):
    """T fused GR_A steps with VMEM-resident weights and an in-kernel h carry.

    xs:(T,B,I), a_seq:(T,I,I), g_seq:(T,B,H), h0:(B,H) -> (h:(T,B,H), c:(T,B,H)).
    Weight slabs use constant index_maps, so they are DMA'd once per sequence.
    """
    T, B, I = xs.shape
    H = h0.shape[1]
    assert I == H
    mm = prepped["w_x5"].dtype
    mm_isz = np.dtype(mm).itemsize

    scratch = [pltpu.VMEM((B, H), jnp.float32),    # carried h (f32 elementwise math)
               pltpu.VMEM((B, 2 * H), mm)]         # persistent [h | g] MXU slab
    scratch_bytes = B * H * 4 + B * 2 * H * mm_isz

    operands = [((B, I), jnp.float32), ((I, I), jnp.float32), ((B, H), jnp.float32),
                ((B, H), jnp.float32), ((I, 5 * H), mm), ((2 * H, 5 * H), mm),
                ((H, H), mm), ((1, 5 * H), jnp.float32), ((B, 2 * H), jnp.float32)]

    out = pl.pallas_call(
        partial(_gr_a_seq_kernel, I, H),
        out_shape=jax.ShapeDtypeStruct((T, B, 2 * H), jnp.float32),
        grid=(T,),
        in_specs=[
            pl.BlockSpec((None, B, I), lambda t: (t, 0, 0)),       # x_t
            pl.BlockSpec((None, I, I), lambda t: (t, 0, 0)),       # a_t
            pl.BlockSpec((None, B, H), lambda t: (t, 0, 0)),       # g_t
            pl.BlockSpec((B, H), lambda t: (0, 0)),                # h0 (used at t==0)
            pl.BlockSpec((I, 5 * H), lambda t: (0, 0)),            # W_x5  (resident)
            pl.BlockSpec((2 * H, 5 * H), lambda t: (0, 0)),        # W_hg5 (resident)
            pl.BlockSpec((H, H), lambda t: (0, 0)),                # WhhT  (resident)
            pl.BlockSpec((1, 5 * H), lambda t: (0, 0)),            # b5    (resident)
        ],
        out_specs=pl.BlockSpec((None, B, 2 * H), lambda t: (t, 0, 0)),
        scratch_shapes=scratch,
        compiler_params=pltpu.CompilerParams(
            dimension_semantics=("arbitrary",),        # sequential: h carry across steps
            vmem_limit_bytes=_vmem_limit_bytes(operands, scratch_bytes)),
    )(xs, a_seq, g_seq, h0,
      prepped["w_x5"], prepped["w_hg5"], prepped["whhT"], prepped["b5"])

    return out[..., :H], out[..., H:]


# ---------------------------------------------------------------------------
# Pure-JAX reference mirroring the PyTorch forward exactly (full-precision dots).
# ---------------------------------------------------------------------------
def gr_a_reference(x, h, a, g, p):
    hp = lax.Precision.HIGHEST
    lin = lambda v, w, b=None: jnp.dot(v, w.T, precision=hp) + (0.0 if b is None else b)
    sig, tanh = jax.nn.sigmoid, jnp.tanh
    xp = lin(x, a)
    z = sig(lin(xp, p["weight_xz"], p["bias_z"]) + lin(h, p["weight_hz"]) + lin(g, p["weight_gz"]))
    i = sig(lin(xp, p["weight_xi"], p["bias_z"]) + lin(h, p["weight_hi"]) + lin(g, p["weight_gi"]))  # bias_z reuse: matches PyTorch
    r = sig(lin(xp, p["weight_xr"], p["bias_r"]) + lin(h, p["weight_hr"]) + lin(g, p["weight_gr"]))
    h_tilde = tanh(lin(xp, p["weight_xh"], p["bias_h"]) + lin(r * h, p["weight_hh"]) + lin(g, p["weight_gh"]))
    c = (1.0 - z) * xp + z * h_tilde + i * h
    o = sig(lin(xp, p["weight_xo"], p["bias_o"]) + lin(h, p["weight_ho"]) + lin(g, p["weight_go"]))
    return o * tanh(c), c


def init_params(key, input_size, hidden_size):
    stdv = 1.0 / math.sqrt(hidden_size)
    names_shapes = []
    for gate in ("z", "i", "r", "h", "o"):
        names_shapes += [(f"weight_x{gate}", (hidden_size, input_size)),
                         (f"weight_h{gate}", (hidden_size, hidden_size)),
                         (f"weight_g{gate}", (hidden_size, hidden_size)),
                         (f"bias_{gate}", (hidden_size,))]
    keys = jax.random.split(key, len(names_shapes))
    return {name: jax.random.uniform(k, shape, jnp.float32, -stdv, stdv)
            for (name, shape), k in zip(names_shapes, keys)}


if __name__ == "__main__":
    B, INPUT, HIDDEN, T = 8, 32, 32, 4     # INPUT must equal HIDDEN (module requirement)

    root = jax.random.PRNGKey(0)
    kx, kh, ka, kg, kp, kxs, kas, kgs = jax.random.split(root, 8)

    x = jax.random.normal(kx, (B, INPUT), jnp.float32)
    h = jax.random.normal(kh, (B, HIDDEN), jnp.float32)
    a = jax.random.normal(ka, (INPUT, INPUT), jnp.float32)
    g = jax.random.normal(kg, (B, HIDDEN), jnp.float32)
    params = init_params(kp, INPUT, HIDDEN)

    step = jax.jit(gr_a_forward)
    h_ref, c_ref = gr_a_reference(x, h, a, g, params)

    # --- single step, f32 MXU operands: strict check against the reference -------
    prepped_f32 = prepare_gr_a_weights(params, INPUT, HIDDEN, matmul_dtype=jnp.float32)
    h_next, c = step(x, h, a, g, prepped_f32)
    jax.block_until_ready((h_next, c))
    assert jnp.allclose(h_next, h_ref, atol=2e-3, rtol=2e-3), "h_next mismatch (f32 path)"
    assert jnp.allclose(c, c_ref, atol=2e-3, rtol=2e-3), "c mismatch (f32 path)"

    # --- single step, bf16 MXU operands (the default): sanity check --------------
    prepped_bf16 = prepare_gr_a_weights(params, INPUT, HIDDEN)   # default bf16 operands
    h_bf, c_bf = step(x, h, a, g, prepped_bf16)
    jax.block_until_ready((h_bf, c_bf))
    assert bool(jnp.all(jnp.isfinite(h_bf))) and bool(jnp.all(jnp.isfinite(c_bf)))
    assert float(jnp.max(jnp.abs(h_bf - h_ref))) < 0.5, "bf16 path diverged"

    # --- T-step sequence with VMEM-resident weights (f32): strict check ----------
    xs = jax.random.normal(kxs, (T, B, INPUT), jnp.float32)
    a_seq = jax.random.normal(kas, (T, INPUT, INPUT), jnp.float32)
    g_seq = jax.random.normal(kgs, (T, B, HIDDEN), jnp.float32)

    h_seq, c_seq = jax.jit(gr_a_sequence)(xs, h, a_seq, g_seq, prepped_f32)
    jax.block_until_ready((h_seq, c_seq))

    h_t = h
    for t in range(T):
        h_t, c_t = gr_a_reference(xs[t], h_t, a_seq[t], g_seq[t], params)
        assert jnp.allclose(h_seq[t], h_t, atol=2e-3, rtol=2e-3), f"h mismatch at step {t}"
        assert jnp.allclose(c_seq[t], c_t, atol=2e-3, rtol=2e-3), f"c mismatch at step {t}"

    print("KERNEL_OK")
</pallas_src>

<mosaic_0001>
module attributes {stable_mosaic.version = 11 : i64} {
  func.func @_gr_a_step_kernel(%arg0: memref<8x32xf32, #tpu.memory_space<vmem>>, %arg1: memref<8x64xf32, #tpu.memory_space<vmem>>, %arg2: memref<32x32xf32, #tpu.memory_space<vmem>>, %arg3: memref<32x160xf32, #tpu.memory_space<vmem>>, %arg4: memref<64x160xf32, #tpu.memory_space<vmem>>, %arg5: memref<32x32xf32, #tpu.memory_space<vmem>>, %arg6: memref<1x160xf32, #tpu.memory_space<vmem>>, %arg7: memref<8x64xf32, #tpu.memory_space<vmem>>) attributes {dimension_semantics = [], scalar_prefetch = 0 : i64, scratch_operands = 0 : i64, tpu.core_type = #tpu.core_type<tc>} {
    %c0 = arith.constant 0 : index
    %c0_0 = arith.constant 0 : index
    %0 = vector.load %arg1[%c0, %c0_0] : memref<8x64xf32, #tpu.memory_space<vmem>>, vector<8x64xf32>
    %1 = vector.extract_strided_slice %0 {offsets = [0, 0], sizes = [8, 32], strides = [1, 1]} : vector<8x64xf32> to vector<8x32xf32>
    %c0_1 = arith.constant 0 : index
    %c0_2 = arith.constant 0 : index
    %2 = vector.load %arg2[%c0_1, %c0_2] : memref<32x32xf32, #tpu.memory_space<vmem>>, vector<32x32xf32>
    %3 = tpu.transpose %2, [1, 0] : vector<32x32xf32> -> vector<32x32xf32>
    %c0_3 = arith.constant 0 : index
    %c0_4 = arith.constant 0 : index
    %4 = vector.load %arg0[%c0_3, %c0_4] : memref<8x32xf32, #tpu.memory_space<vmem>>, vector<8x32xf32>
    %cst = arith.constant dense<0.000000e+00> : vector<8x32xf32>
    %5 = tpu.matmul %4, %3, %cst {dimension_numbers = #tpu.dot_dimension_numbers<[1], [0], [0], [1], [0, 0, 1, 1], [], []>, precision = #tpu.contract_precision<fp32>} : vector<8x32xf32>, vector<32x32xf32>, vector<8x32xf32> -> vector<8x32xf32>
    %c0_5 = arith.constant 0 : index
    %c0_6 = arith.constant 0 : index
    %6 = vector.load %arg4[%c0_5, %c0_6] : memref<64x160xf32, #tpu.memory_space<vmem>>, vector<64x160xf32>
    %cst_7 = arith.constant dense<0.000000e+00> : vector<8x160xf32>
    %7 = tpu.matmul %0, %6, %cst_7 {dimension_numbers = #tpu.dot_dimension_numbers<[1], [0], [0], [1], [0, 0, 1, 1], [], []>, precision = #tpu.contract_precision<fp32>} : vector<8x64xf32>, vector<64x160xf32>, vector<8x160xf32> -> vector<8x160xf32>
    %c0_8 = arith.constant 0 : index
    %c0_9 = arith.constant 0 : index
    %8 = vector.load %arg3[%c0_8, %c0_9] : memref<32x160xf32, #tpu.memory_space<vmem>>, vector<32x160xf32>
    %cst_10 = arith.constant dense<0.000000e+00> : vector<8x160xf32>
    %9 = tpu.matmul %5, %8, %cst_10 {dimension_numbers = #tpu.dot_dimension_numbers<[1], [0], [0], [1], [0, 0, 1, 1], [], []>, precision = #tpu.contract_precision<fp32>} : vector<8x32xf32>, vector<32x160xf32>, vector<8x160xf32> -> vector<8x160xf32>
    %10 = arith.addf %7, %9 : vector<8x160xf32>
    %c0_11 = arith.constant 0 : index
    %c0_12 = arith.constant 0 : index
    %11 = vector.load %arg6[%c0_11, %c0_12] : memref<1x160xf32, #tpu.memory_space<vmem>>, vector<1x160xf32>
    %12 = vector.broadcast %11 : vector<1x160xf32> to vector<8x160xf32>
    %13 = arith.addf %10, %12 : vector<8x160xf32>
    %c0_13 = arith.constant 0 : index
    %c0_14 = arith.constant 0 : index
    %14 = vector.load %arg5[%c0_13, %c0_14] : memref<32x32xf32, #tpu.memory_space<vmem>>, vector<32x32xf32>
    %15 = vector.extract_strided_slice %13 {offsets = [0, 0], sizes = [8, 128], strides = [1, 1]} : vector<8x160xf32> to vector<8x128xf32>
    %16 = arith.negf %15 : vector<8x128xf32>
    %17 = math.exp %16 : vector<8x128xf32>
    %cst_15 = arith.constant 1.000000e+00 : f32
    %18 = vector.broadcast %cst_15 : f32 to vector<8x128xf32>
    %19 = arith.addf %18, %17 : vector<8x128xf32>
    %20 = arith.divf %18, %19 : vector<8x128xf32>
    %21 = vector.extract_strided_slice %20 {offsets = [0, 0], sizes = [8, 32], strides = [1, 1]} : vector<8x128xf32> to vector<8x32xf32>
    %22 = vector.extract_strided_slice %20 {offsets = [0, 32], sizes = [8, 32], strides = [1, 1]} : vector<8x128xf32> to vector<8x32xf32>
    %23 = vector.extract_strided_slice %20 {offsets = [0, 64], sizes = [8, 32], strides = [1, 1]} : vector<8x128xf32> to vector<8x32xf32>
    %24 = vector.extract_strided_slice %20 {offsets = [0, 96], sizes = [8, 32], strides = [1, 1]} : vector<8x128xf32> to vector<8x32xf32>
    %25 = arith.mulf %23, %1 : vector<8x32xf32>
    %cst_16 = arith.constant dense<0.000000e+00> : vector<8x32xf32>
    %26 = tpu.matmul %25, %14, %cst_16 {dimension_numbers = #tpu.dot_dimension_numbers<[1], [0], [0], [1], [0, 0, 1, 1], [], []>, precision = #tpu.contract_precision<fp32>} : vector<8x32xf32>, vector<32x32xf32>, vector<8x32xf32> -> vector<8x32xf32>
    %27 = vector.extract_strided_slice %13 {offsets = [0, 128], sizes = [8, 32], strides = [1, 1]} : vector<8x160xf32> to vector<8x32xf32>
    %28 = arith.addf %27, %26 : vector<8x32xf32>
    %29 = math.tanh %28 : vector<8x32xf32>
    %cst_17 = arith.constant 1.000000e+00 : f32
    %30 = vector.broadcast %cst_17 : f32 to vector<8x32xf32>
    %31 = arith.subf %30, %21 : vector<8x32xf32>
    %32 = arith.mulf %31, %5 : vector<8x32xf32>
    %33 = arith.mulf %21, %29 : vector<8x32xf32>
    %34 = arith.addf %32, %33 : vector<8x32xf32>
    %35 = arith.mulf %22, %1 : vector<8x32xf32>
    %36 = arith.addf %34, %35 : vector<8x32xf32>
    %37 = math.tanh %36 : vector<8x32xf32>
    %38 = arith.mulf %24, %37 : vector<8x32xf32>
    %c0_18 = arith.constant 0 : index
    %c0_19 = arith.constant 0 : index
    %39 = vector.load %arg7[%c0_18, %c0_19] : memref<8x64xf32, #tpu.memory_space<vmem>>, vector<8x32xf32>
    tpu.vector_store %arg7[%c0_18, %c0_19], %38 {strides = array<i32>} : memref<8x64xf32, #tpu.memory_space<vmem>>, vector<8x32xf32>,
    %c0_20 = arith.constant 0 : index
    %c32 = arith.constant 32 : index
    %40 = vector.load %arg7[%c0_20, %c32] : memref<8x64xf32, #tpu.memory_space<vmem>>, vector<8x32xf32>
    tpu.vector_store %arg7[%c0_20, %c32], %36 {strides = array<i32>} : memref<8x64xf32, #tpu.memory_space<vmem>>, vector<8x32xf32>,
    return
  }
}

</mosaic_0001>

<bundles_post_ra>
// kernel: gr_a_forward.1
= control target key start
LH: loop header
LB: loop body
LE: loop exit
PB: predicated region body
PF: predicated region fallthrough
CT: control target
= control target key end

     0   :  { %12 = vsyncpa [#allocation3], 0  ;;  %s3359_s0 = inlined_call_operand.vmem [shape: f32[8,32], index: 0, kind: input, shape index: {}]   ;;  %s3360_s1 = inlined_call_operand.vmem [shape: f32[8,64], index: 1, kind: input, shape index: {}]   ;;  %s3361_s2 = inlined_call_operand.hbm [shape: f32[32,32], index: 2, kind: input, shape index: {}]   ;;  %s3362_s3 = inlined_call_operand.hbm [shape: f32[32,160], index: 3, kind: input, shape index: {}]   ;;  %s3363_s4 = inlined_call_operand.hbm [shape: f32[64,160], index: 4, kind: input, shape index: {}]   ;;  %s3364_s5 = inlined_call_operand.vmem [shape: f32[32,32], index: 5, kind: input, shape index: {}]   ;;  %s3365_s6 = inlined_call_operand.vmem [shape: f32[1,160], index: 6, kind: input, shape index: {}]   ;;  %s3366_s7 = inlined_call_operand.vmem [shape: f32[8,64], index: 7, kind: output, shape index: {}]  }
   0x1   :  { %13 = vsyncpa [#allocation5], 0  ;;  %s2893_s24 = smov [#allocation4]   ;;  %s2823_s28 = scalar_lea.hbm %s3362_s3, 1024 }
   0x2   :  { %s35_s25 = sshll.u32 %s2893_s24, 4  ;;  %p2824_p0 = scmp.ne.s32.totalorder %s3362_s3, %s2823_s28  ;;  %s36_s25 = int_to_ptr.vmem [resolvable:$true] %s35_s25 }
   0x3   :  { %p2827_p1 = scmp.lt.u32.totalorder %s2823_s28, %s3362_s3 }
   0x5   :  { %p2829_p2 = pnand %p2827_p1, %p2824_p0 }
   0x7   :  { %2832 = shalt.err (!%p2829_p2)
}
   0x8   :  { %s2833_s10 = scalar_lea.vmem %s36_s25, 1024  ;;  %p2838_p4 = scmp.lt.s32.totalorder %s36_s25, %s36_s25 }
   0x9   :  { %p2834_p3 = scmp.ne.s32.totalorder %s36_s25, %s2833_s10  ;;  %p2839_p5 = scmp.lt.s32.totalorder %s2833_s10, %s2833_s10 }
   0xb   :  { %p2840_p6 = por %p2839_p5, %p2838_p4 }
   0xd   :  { %p2841_p7 = pnand %p2840_p6, %p2834_p3 }
   0xf   :  { %2844 = shalt.err (!%p2841_p7)
}
  0x10   :  { %s2894_s11 = smov 256   ;;  %s2895_s12 = smov 16  }
  0x11   :  { %41 = dma.hbm_to_vmem [thread:$0]  %s3362_s3, 1024, %s36_s25, [#allocation5], %s2894_s11, %s2894_s11, %s2895_s12  }
  0x12   :  { %s2896_s15 = smov [#allocation2]   ;;  %s2845_s19 = scalar_lea.hbm %s3361_s2, 512 }
  0x13   :  { %s23_s16 = sshll.u32 %s2896_s15, 4  ;;  %p2846_p8 = scmp.ne.s32.totalorder %s3361_s2, %s2845_s19  ;;  %s24_s16 = int_to_ptr.vmem [resolvable:$true] %s23_s16 }
  0x14   :  { %p2849_p9 = scmp.lt.u32.totalorder %s2845_s19, %s3361_s2 }
  0x16   :  { %p2851_p10 = pnand %p2849_p9, %p2846_p8 }
  0x18   :  { %2854 = shalt.err (!%p2851_p10)
}
  0x19   :  { %s2855_s24 = scalar_lea.vmem %s24_s16, 512  ;;  %p2860_p12 = scmp.lt.s32.totalorder %s24_s16, %s24_s16 }
  0x1a   :  { %p2856_p11 = scmp.ne.s32.totalorder %s24_s16, %s2855_s24  ;;  %p2861_p13 = scmp.lt.s32.totalorder %s2855_s24, %s2855_s24 }
  0x1c   :  { %p2862_p0 = por %p2861_p13, %p2860_p12 }
  0x1e   :  { %p2863_p1 = pnand %p2862_p0, %p2856_p11 }
  0x20   :  { %2866 = shalt.err (!%p2863_p1)
}
  0x21   :  { %s2897_s3 = smov 128   ;;  %s2898_s25 = smov 8  }
  0x22   :  { %29 = dma.hbm_to_vmem [thread:$0]  %s3361_s2, 512, %s24_s16, [#allocation3], %s2897_s3, %s2897_s3, %s2898_s25  }
  0x23   :  { %s2899_s28 = smov [#allocation6]   ;;  %s2867_s9 = scalar_lea.hbm %s3363_s4, 2048 }
  0x24   :  { %s47_s29 = sshll.u32 %s2899_s28, 4  ;;  %p2868_p2 = scmp.ne.s32.totalorder %s3363_s4, %s2867_s9  ;;  %s48_s29 = int_to_ptr.vmem [resolvable:$true] %s47_s29 }
  0x25   :  { %p2871_p3 = scmp.lt.u32.totalorder %s2867_s9, %s3363_s4 }
  0x27   :  { %p2873_p4 = pnand %p2871_p3, %p2868_p2 }
  0x29   :  { %2876 = shalt.err (!%p2873_p4)
}
  0x2a   :  { %s2877_s17 = scalar_lea.vmem %s48_s29, 2048  ;;  %p2882_p6 = scmp.lt.s32.totalorder %s48_s29, %s48_s29 }
  0x2b   :  { %p2878_p5 = scmp.ne.s32.totalorder %s48_s29, %s2877_s17  ;;  %p2883_p7 = scmp.lt.s32.totalorder %s2877_s17, %s2877_s17 }
  0x2d   :  { %p2884_p8 = por %p2883_p7, %p2882_p6 }
  0x2f   :  { %p2885_p9 = pnand %p2884_p8, %p2878_p5 }
  0x31   :  { %2888 = shalt.err (!%p2885_p9)
}
  0x32   :  { %53 = dma.hbm_to_vmem [thread:$0]  %s3363_s4, 2048, %s48_s29, [#allocation5], %s2894_s11, %s2894_s11, %s2895_s12  }
  0x33   :  { %2889 = dma.done.wait [#allocation3], 512  }
  0x34   :  { %2890 = vsyncadd [#allocation3], 4294966784 }
  0x35   :  { %2891 = dma.done.wait [#allocation5], 3072  }
  0x36   :  { %2892 = vsyncadd [#allocation5], 4294964224  ;;  %v3367_v0 = vmov 0.0|0.0   ;;  %vm2901_vm0 = vmmov 0   ;;  %v2902_v1 = vmov 0.0   ;;  %vm73_vm1 = vcmask 261120  }
  0x37   :  { %2544 = vmatprep.subr.bf16.mxu0 %v3367_v0  ;;  %2420 = vmatprep.mubr.msk.f32.mxu0 %vm2901_vm0, %v2902_v1  ;;  %v68_v2 = vld [vmem:[#allocation2] sm:$0xff]  ;;  %v69_v3 = vld [vmem:[#allocation2 + $0x8] sm:$0xff]  ;;  %v70_v4 = vld [vmem:[#allocation2 + $0x10] sm:$0xff]  ;;  %s2903_s18 = smov 32   ;;  %s2904_s19 = smov 64   ;;  %vm1144_vm2 = vcmask 523264  }
  0x38   :  { %673 = vmatprep.mubr.f32.mxu1 %v2902_v1  ;;  %v78_v5 = vsel %vm73_vm1, %v68_v2, 0  ;;  %v81_v6 = vsel %vm73_vm1, %v69_v3, 0  ;;  %v71_v7 = vld [vmem:[#allocation2 + $0x18] sm:$0xff]  ;;  %v72_v8 = vld [vmem:[%s3359_s0] sm:$0xff]  ;;  %v84_v11 = vsel %vm73_vm1, %v70_v4, 0  ;;  %v591_v45 = vld [vmem:[#allocation4 + $0x8] sm:$0xff] }
  0x39   :  { %v90_v9 = vand.u32 4294901760, %v78_v5  ;;  %v93_v10 = vand.u32 4294901760, %v81_v6  ;;  %v87_v12 = vsel %vm73_vm1, %v71_v7, 0  ;;  %v75_v13 = vsel %vm73_vm1, %v72_v8, 0  ;;  %v593_v46 = vld [vmem:[#allocation4 + $0x18] sm:$0xff]  ;;  %v590_v49 = vld [vmem:[#allocation4] sm:$0xff] }
  0x3a   :  { %v158_v17 = vand.u32 4294901760, %v75_v13  ;;  %v96_v18 = vand.u32 4294901760, %v84_v11  ;;  %v99_v19 = vand.u32 4294901760, %v87_v12  ;;  %v601_v47 = vand.u32 4294901760, %v591_v45  ;;  %v592_v50 = vld [vmem:[#allocation4 + $0x10] sm:$0xff]  ;;  %v595_v59 = vld [vmem:[#allocation4 + $0x28] sm:$0xff] }
  0x3b   :  { %v2545_v14 = vpack.c.bf16 %v93_v10, %v90_v9  ;;  %v170_v15 = vsub.f32 %v78_v5, %v90_v9  ;;  %v177_v16 = vsub.f32 %v81_v6, %v93_v10  ;;  %v605_v48 = vand.u32 4294901760, %v593_v46  ;;  %v597_v60 = vld [vmem:[#allocation4 + $0x38] sm:$0xff]  ;;  %v594_v63 = vld [vmem:[#allocation4 + $0x20] sm:$0xff]  ;;  %v596_v2 = vld [vmem:[#allocation4 + $0x30] sm:$0xff] }
  0x3c   :  { %v159_v22 = vsub.f32 %v75_v13, %v158_v17  ;;  %v184_v23 = vsub.f32 %v84_v11, %v96_v18  ;;  %v2548_v25 = vpack.c.bf16 %v99_v19, %v96_v18  ;;  %v191_v26 = vsub.f32 %v87_v12, %v99_v19 }
  0x3d   :  { %2546 = vmatpush3.bf16.xpose.msra.mxu0 %v2545_v14  ;;  %v171_v20 = vand.u32 4294901760, %v170_v15  ;;  %v178_v21 = vand.u32 4294901760, %v177_v16  ;;  %v2557_v41 = vpack.c.bf16 %v177_v16, %v170_v15  ;;  %v603_v51 = vand.u32 4294901760, %v590_v49 }
  0x3e   :  { %2547 = vmatprep.subr.bf16.mxu0 %v3367_v0  ;;  %v160_v24 = vand.u32 4294901760, %v159_v22  ;;  %v185_v32 = vand.u32 4294901760, %v184_v23  ;;  %v192_v33 = vand.u32 4294901760, %v191_v26  ;;  %v2560_v42 = vpack.c.bf16 %v191_v26, %v184_v23 }
  0x3f   :  { %v172_v27 = vsub.f32 %v170_v15, %v171_v20  ;;  %v179_v28 = vsub.f32 %v177_v16, %v178_v21  ;;  %v2569_v43 = vpack.c.bf16 %v178_v21, %v171_v20  ;;  %v607_v52 = vand.u32 4294901760, %v592_v50 }
  0x40   :  { %v161_v29 = vsub.f32 %v159_v22, %v160_v24  ;;  %v186_v36 = vsub.f32 %v184_v23, %v185_v32  ;;  %v193_v37 = vsub.f32 %v191_v26, %v192_v33  ;;  %v2572_v44 = vpack.c.bf16 %v192_v33, %v185_v32 }
  0x41   :  { %v173_v30 = vand.u32 4294901760, %v172_v27  ;;  %v180_v31 = vand.u32 4294901760, %v179_v28  ;;  %v3024_v53 = vpack.c.bf16 %v605_v48, %v601_v47  ;;  %v3026_v54 = vsub.f32 %v591_v45, %v601_v47 }
  0x42   :  { %v162_v34 = vand.u32 4294901760, %v161_v29  ;;  %v187_v38 = vand.u32 4294901760, %v186_v36  ;;  %v194_v39 = vand.u32 4294901760, %v193_v37  ;;  %v3028_v55 = vsub.f32 %v593_v46, %v605_v48 }
  0x43   :  { %v2551_v35 = vpack.c.bf16 %v180_v31, %v173_v30  ;;  %v3030_v56 = vpack.c.bf16 %v607_v52, %v603_v51  ;;  %v3032_v57 = vsub.f32 %v590_v49, %v603_v51  ;;  %v3034_v58 = vsub.f32 %v592_v50, %v607_v52  ;;  %2581 = vmatprep.subr.bf16.mxu1 %v3024_v53 }
  0x44   :  { %v2554_v40 = vpack.c.bf16 %v194_v39, %v187_v38  ;;  %v609_v61 = vand.u32 4294901760, %v595_v59  ;;  %v613_v62 = vand.u32 4294901760, %v597_v60  ;;  %v687_v3 = vand.u32 4294901760, %v3026_v54 }
  0x45   :  { %2549 = vmatpush3.bf16.xpose.msra.mxu0 %v2548_v25  ;;  %v699_v4 = vand.u32 4294901760, %v3028_v55  ;;  %2583 = vmatpush1.bf16.msra.mxu1 %v3030_v56  ;;  %v611_v5 = vand.u32 4294901760, %v594_v63  ;;  %v615_v6 = vand.u32 4294901760, %v596_v2  ;;  %v693_v7 = vand.u32 4294901760, %v3032_v57 }
  0x46   :  { %2550 = vmatprep.subr.bf16.mxu0 %v3367_v0  ;;  %v705_v8 = vand.u32 4294901760, %v3034_v58  ;;  %v3042_v9 = vpack.c.bf16 %v613_v62, %v609_v61  ;;  %v710_v10 = vsub.f32 %v595_v59, %v609_v61  ;;  %v722_v11 = vsub.f32 %v597_v60, %v613_v62  ;;  %v577_v59 = vld [vmem:[#allocation6 + $0x18] sm:$0xff]  ;;  %v574_v60 = vld [vmem:[#allocation6] sm:$0xff]  ;;  %v576_v61 = vld [vmem:[#allocation6 + $0x10] sm:$0xff] }
  0x47   :  { %v688_v12 = vsub.f32 %v3026_v54, %v687_v3  ;;  %v3045_v13 = vpack.c.bf16 %v615_v6, %v611_v5  ;;  %v728_v15 = vsub.f32 %v596_v2, %v615_v6  ;;  %v700_v16 = vsub.f32 %v3028_v55, %v699_v4  ;;  %v579_v62 = vld [vmem:[#allocation6 + $0x28] sm:$0xff] }
  0x48   :  { %2585 = vmatprep.subr.bf16.mxu1 %v3042_v9  ;;  %v694_v18 = vsub.f32 %v3032_v57, %v693_v7  ;;  %v706_v19 = vsub.f32 %v3034_v58, %v705_v8  ;;  %v711_v21 = vand.u32 4294901760, %v710_v10  ;;  %v2596_v39 = vpack.c.bf16 %v3028_v55, %v3026_v54 }
  0x49   :  { %2587 = vmatpush1.bf16.msra.mxu1 %v3045_v13  ;;  %v701_v20 = vand.u32 4294901760, %v700_v16  ;;  %v729_v26 = vand.u32 4294901760, %v728_v15  ;;  %v1152_v2 = vand.u32 4294901760, %v577_v59  ;;  %v1150_v6 = vand.u32 4294901760, %v574_v60 }
  0x4a   :  { %v695_v23 = vand.u32 4294901760, %v694_v18  ;;  %v712_v28 = vsub.f32 %v710_v10, %v711_v21  ;;  %vm2343_vm3 = vcmask 523520  }
  0x4b   :  { %v730_v32 = vsub.f32 %v728_v15, %v729_v26 }
  0x4c   :  { %2421 = vmatmul.mubr.f32.vlgmr.msra.gmra.mrb[0].mxu0 %v162_v34  ;;  %v713_v33 = vand.u32 4294901760, %v712_v28 }
  0x4d   :  { %2552 = vmatpush3.bf16.xpose.msra.mxu0 %v2551_v35  ;;  %2431 = vmatprep.mubr.msk.f32.mxu0 %vm2901_vm0, %v2902_v1  ;;  %v731_v36 = vand.u32 4294901760, %v730_v32 }
  0x4e   :  { %2553 = vmatprep.subr.bf16.mxu0 %v3367_v0 }
  0x55   :  { %2555 = vmatpush3.bf16.xpose.msra.mxu0 %v2554_v40  ;;  %v2598_v40 = vpack.c.bf16 %v3034_v58, %v3032_v57  ;;  %v67_v57 = vld [vmem:[%s3360_s1] sm:$0xff]  ;;  %v575_v58 = vld [vmem:[#allocation6 + $0x8] sm:$0xff] }
  0x56   :  { %2556 = vmatprep.subr.bf16.mxu0 %v3367_v0  ;;  %2319 = vrot.lane.b32.xlu1 %v67_v57, %s2903_s18 }
  0x57   :  { %1819 = vrot.lane.b32.xlu0 %v67_v57, %s2904_s19 }
  0x5c   :  { %2432 = vmatmul.mubr.f32.vlgmr.msra.gmra.mrb[0].mxu0 %v158_v17 }
  0x5d   :  { %2558 = vmatpush3.bf16.xpose.msra.mxu0 %v2557_v41  ;;  %2442 = vmatprep.mubr.msk.f32.mxu0 %vm2901_vm0, %v2902_v1  ;;  %v2600_v41 = vpack.c.bf16 %v722_v11, %v710_v10  ;;  %v1154_v10 = vand.u32 4294901760, %v576_v61 }
  0x5e   :  { %2559 = vmatprep.subr.bf16.mxu0 %v3367_v0 }
  0x65   :  { %2561 = vmatpush3.bf16.xpose.msra.mxu0 %v2560_v42 }
  0x66   :  { %2562 = vmatprep.subr.bf16.mxu0 %v3367_v0 }
  0x6c   :  { %2443 = vmatmul.mubr.f32.vlgmr.msra.gmra.mrb[0].mxu0 %v159_v22  ;;  %v723_v22 = vand.u32 4294901760, %v722_v11 }
  0x6d   :  { %2564 = vmatpush3.bf16.xpose.msra.mxu0 %v2545_v14  ;;  %2453 = vmatprep.mubr.msk.f32.mxu0 %vm2901_vm0, %v2902_v1 }
  0x6e   :  { %2565 = vmatprep.subr.bf16.mxu0 %v3367_v0  ;;  %v724_v29 = vsub.f32 %v722_v11, %v723_v22  ;;  %v2616_v45 = vpack.c.bf16 %v723_v22, %v711_v21  ;;  %v1156_v11 = vand.u32 4294901760, %v579_v62 }
  0x70   :  { %v725_v34 = vand.u32 4294901760, %v724_v29  ;;  %v3092_v21 = vsub.f32 %v579_v62, %v1156_v11 }
  0x72   :  { %v2592_v37 = vpack.c.bf16 %v725_v34, %v713_v33 }
  0x75   :  { %2567 = vmatpush3.bf16.xpose.msra.mxu0 %v2548_v25 }
  0x76   :  { %2568 = vmatprep.subr.bf16.mxu0 %v3367_v0 }
  0x7c   :  { %2454 = vmatmul.mubr.f32.vlgmr.msra.gmra.mrb[0].mxu0 %v160_v24  ;;  %v707_v24 = vand.u32 4294901760, %v706_v19  ;;  %v3088_v19 = vsub.f32 %v574_v60, %v1150_v6 }
  0x7d   :  { %2570 = vmatpush3.bf16.xpose.msra.mxu0 %v2569_v43  ;;  %2464 = vmatprep.mubr.msk.f32.mxu0 %vm2901_vm0, %v2902_v1  ;;  %v2612_v43 = vpack.c.bf16 %v699_v4, %v687_v3  ;;  %v581_v3 = vld [vmem:[#allocation6 + $0x38] sm:$0xff]  ;;  %v578_v4 = vld [vmem:[#allocation6 + $0x20] sm:$0xff] }
  0x7e   :  { %2571 = vmatprep.subr.bf16.mxu0 %v3367_v0  ;;  %v2590_v30 = vpack.c.bf16 %v707_v24, %v695_v23  ;;  %v582_v24 = vld [vmem:[#allocation6 + $0x40] sm:$0xff] }
  0x7f   :  { %v1166_v33 = vand.u32 4294901760, %v582_v24 }
  0x85   :  { %2573 = vmatpush3.bf16.xpose.msra.mxu0 %v2572_v44  ;;  %v2614_v44 = vpack.c.bf16 %v705_v8, %v693_v7  ;;  %v3081_v8 = vsub.f32 %v577_v59, %v1152_v2 }
  0x86   :  { %2574 = vmatprep.subr.bf16.mxu0 %v3367_v0 }
  0x8c   :  { %2465 = vmatmul.mubr.f32.vlgmr.msra.gmra.mrb[0].mxu0 %v158_v17 }
  0x8d   :  { %2576 = vmatpush3.bf16.xpose.msra.mxu0 %v2545_v14  ;;  %2475 = vmatprep.mubr.msk.f32.mxu0 %vm2901_vm0, %v2902_v1  ;;  %v716_v14 = vsub.f32 %v594_v63, %v611_v5  ;;  %v1148_v63 = vand.u32 4294901760, %v575_v58  ;;  %v580_v5 = vld [vmem:[#allocation6 + $0x30] sm:$0xff] }
  0x8e   :  { %2577 = vmatprep.subr.bf16.mxu0 %v3367_v0  ;;  %v1162_v16 = vand.u32 4294901760, %v580_v5 }
  0x8f   :  { %v2602_v42 = vpack.c.bf16 %v728_v15, %v716_v14  ;;  %v3079_v7 = vsub.f32 %v575_v58, %v1148_v63  ;;  %v1158_v15 = vand.u32 4294901760, %v578_v4  ;;  %v3086_v18 = vpack.c.bf16 %v1152_v2, %v1148_v63 }
  0x90   :  { %v3110_v32 = vsub.f32 %v580_v5, %v1162_v16 }
  0x91   :  { %v3103_v28 = vpack.c.bf16 %v1162_v16, %v1158_v15  ;;  %v1242_v29 = vand.u32 4294901760, %v3079_v7 }
  0x92   :  { %v1284_v2 = vand.u32 4294901760, %v3110_v32 }
  0x95   :  { %2579 = vmatpush3.bf16.xpose.msra.mxu0 %v2548_v25  ;;  %v717_v25 = vand.u32 4294901760, %v716_v14 }
  0x96   :  { %2724 = vmatprep.subr.bf16.mxu0 %v3367_v0 }
  0x97   :  { %v718_v31 = vsub.f32 %v716_v14, %v717_v25  ;;  %v2618_v46 = vpack.c.bf16 %v729_v26, %v717_v25  ;;  %v585_v14 = vld [vmem:[#allocation6 + $0x58] sm:$0xff]  ;;  %v3094_v25 = vpack.c.bf16 %v1154_v10, %v1150_v6 }
  0x98   :  { %v1168_v23 = vand.u32 4294901760, %v585_v14 }
  0x99   :  { %v719_v35 = vand.u32 4294901760, %v718_v31  ;;  %v3108_v31 = vsub.f32 %v578_v4, %v1158_v15 }
  0x9b   :  { %v2594_v38 = vpack.c.bf16 %v731_v36, %v719_v35  ;;  %v587_v35 = vld [vmem:[#allocation6 + $0x68] sm:$0xff]  ;;  %v589_v36 = vld [vmem:[#allocation6 + $0x78] sm:$0xff]  ;;  %v1272_v63 = vand.u32 4294901760, %v3108_v31 }
  0x9c   :  { %2476 = vmatmul.mubr.f32.vlgmr.msra.gmra.mrb[0].mxu0 %v158_v17  ;;  %v689_v17 = vand.u32 4294901760, %v688_v12  ;;  %v583_v12 = vld [vmem:[#allocation6 + $0x48] sm:$0xff] }
  0x9d   :  { %2486 = vmatprep.mubr.msk.f32.mxu0 %vm2901_vm0, %v2902_v1  ;;  %v1164_v22 = vand.u32 4294901760, %v583_v12 }
  0x9e   :  { %v2588_v27 = vpack.c.bf16 %v701_v20, %v689_v17  ;;  %v1146_v17 = vsel %vm1144_vm2, %v67_v57, 0  ;;  %v3090_v20 = vsub.f32 %v576_v61, %v1154_v10 }
  0xa0   :  { %2589 = vmatprep.subr.bf16.mxu1 %v2588_v27  ;;  %v3098_v27 = vand.u32 4294901760, %v1146_v17 }
 0x16f   :  { %v3056_v47 = vpop.f32.mrb[0].mxu0 }
 0x170   :  { %v599_v48 = vsel %vm73_vm1, %v3056_v47, 0  ;;  %v2477_v49 = vpop.f32.mrb[1].mxu0 }
 0x171   :  { %v3060_v50 = vand.u32 4294901760, %v599_v48  ;;  %v1243_v49 = vsub.f32 %v3079_v7, %v1242_v29 }
 0x173   :  { %v675_v51 = vsub.f32 %v599_v48, %v3060_v50  ;;  %v1176_v48 = vand.u32 4294901760, %v589_v36  ;;  %v1244_v5 = vand.u32 4294901760, %v1243_v49 }
 0x175   :  { %v676_v52 = vand.u32 4294901760, %v675_v51  ;;  %v3162_v10 = vsub.f32 %v589_v36, %v1176_v48 }
 0x177   :  { %v677_v54 = vsub.f32 %v675_v51, %v676_v52 }
 0x179   :  { %v678_v55 = vand.u32 4294901760, %v677_v54 }
 0x17b   :  { %679 = vmatmul.mubr.f32.vlgmr.msra.gmra.mrb[0].mxu1 %v678_v55 }
 0x17c   :  { %2591 = vmatpush1.bf16.msra.mxu1 %v2590_v30  ;;  %789 = vmatprep.mubr.f32.mxu1 %v2902_v1  ;;  %v1254_v30 = vand.u32 4294901760, %v3081_v8 }
 0x17d   :  { %2593 = vmatprep.subr.bf16.mxu1 %v2592_v37  ;;  %v3112_v37 = vpack.c.bf16 %v1168_v23, %v1164_v22 }
 0x180   :  { %2595 = vmatpush1.bf16.msra.mxu1 %v2594_v38  ;;  %v588_v38 = vld [vmem:[#allocation6 + $0x70] sm:$0xff] }
 0x181   :  { %2597 = vmatprep.subr.bf16.mxu1 %v2596_v39  ;;  %v1248_v39 = vand.u32 4294901760, %v3088_v19  ;;  %v1178_v55 = vand.u32 4294901760, %v588_v38 }
 0x183   :  { %791 = vmatmul.mubr.f32.vlgmr.msra.gmra.mrb[0].mxu1 %v3060_v50  ;;  %v1249_v58 = vsub.f32 %v3088_v19, %v1248_v39 }
 0x184   :  { %2599 = vmatpush1.bf16.msra.mxu1 %v2598_v40  ;;  %877 = vmatprep.mubr.f32.mxu1 %v2902_v1  ;;  %v1260_v40 = vand.u32 4294901760, %v3090_v20 }
 0x185   :  { %2601 = vmatprep.subr.bf16.mxu1 %v2600_v41  ;;  %v1266_v41 = vand.u32 4294901760, %v3092_v21  ;;  %v1250_v15 = vand.u32 4294901760, %v1249_v58 }
 0x186   :  { %v1261_v59 = vsub.f32 %v3090_v20, %v1260_v40 }
 0x187   :  { %v1267_v60 = vsub.f32 %v3092_v21, %v1266_v41 }
 0x188   :  { %2603 = vmatpush1.bf16.msra.mxu1 %v2602_v42  ;;  %v3118_v42 = vsub.f32 %v583_v12, %v1164_v22  ;;  %v1262_v16 = vand.u32 4294901760, %v1261_v59 }
 0x189   :  { %2605 = vmatprep.subr.bf16.mxu1 %v3024_v53 }
 0x18a   :  { %v1290_v12 = vand.u32 4294901760, %v3118_v42  ;;  %v2646_v49 = vpack.c.bf16 %v1262_v16, %v1250_v15 }
 0x18b   :  { %880 = vmatmul.mubr.f32.vlgmr.msra.gmra.mrb[0].mxu1 %v675_v51 }
 0x18c   :  { %2607 = vmatpush1.bf16.msra.mxu1 %v3030_v56  ;;  %958 = vmatprep.mubr.f32.mxu1 %v2902_v1 }
 0x18d   :  { %2609 = vmatprep.subr.bf16.mxu1 %v3042_v9 }
 0x190   :  { %2611 = vmatpush1.bf16.msra.mxu1 %v3045_v13 }
 0x191   :  { %2613 = vmatprep.subr.bf16.mxu1 %v2612_v43  ;;  %v3120_v43 = vsub.f32 %v585_v14, %v1168_v23 }
 0x193   :  { %962 = vmatmul.mubr.f32.vlgmr.msra.gmra.mrb[0].mxu1 %v676_v52  ;;  %v3137_v52 = vsub.f32 %v582_v24, %v1166_v33  ;;  %v1302_v14 = vand.u32 4294901760, %v3120_v43  ;;  %v1273_v24 = vsub.f32 %v3108_v31, %v1272_v63 }
 0x194   :  { %2615 = vmatpush1.bf16.msra.mxu1 %v2614_v44  ;;  %1056 = vmatprep.mubr.f32.mxu1 %v2902_v1  ;;  %v3123_v44 = vsub.f32 %v1146_v17, %v3098_v27  ;;  %v1268_v17 = vand.u32 4294901760, %v1267_v60 }
 0x195   :  { %2617 = vmatprep.subr.bf16.mxu1 %v2616_v45 }
 0x196   :  { %v1231_v61 = vand.u32 4294901760, %v3123_v44 }
 0x198   :  { %2619 = vmatpush1.bf16.msra.mxu1 %v2618_v46  ;;  %v1172_v46 = vand.u32 4294901760, %v587_v35  ;;  %v1232_v22 = vsub.f32 %v3123_v44, %v1231_v61 }
 0x199   :  { %2621 = vmatprep.subr.bf16.mxu1 %v3024_v53  ;;  %v1160_v53 = vand.u32 4294901760, %v581_v3 }
 0x19a   :  { %v3159_v4 = vsub.f32 %v587_v35, %v1172_v46  ;;  %v1296_v35 = vand.u32 4294901760, %v3137_v52 }
 0x19b   :  { %1058 = vmatmul.mubr.f32.vlgmr.msra.gmra.mrb[0].mxu1 %v3060_v50  ;;  %v3096_v26 = vsub.f32 %v581_v3, %v1160_v53  ;;  %v3157_v3 = vpack.c.bf16 %v1176_v48, %v1172_v46  ;;  %v1303_v46 = vsub.f32 %v3120_v43, %v1302_v14 }
 0x19c   :  { %2623 = vmatpush1.bf16.msra.mxu1 %v3030_v56  ;;  %1136 = vmatprep.mubr.f32.mxu1 %v2902_v1  ;;  %v584_v56 = vld [vmem:[#allocation6 + $0x50] sm:$0xff]  ;;  %v1314_v48 = vand.u32 4294901760, %v3159_v4  ;;  %v1297_v59 = vsub.f32 %v3137_v52, %v1296_v35 }
 0x19d   :  { %2625 = vmatprep.subr.bf16.mxu1 %v3042_v9  ;;  %v3101_v9 = vpack.c.bf16 %v1160_v53, %v1156_v11  ;;  %v1170_v34 = vand.u32 4294901760, %v584_v56  ;;  %v1278_v45 = vand.u32 4294901760, %v3096_v26  ;;  %v1304_v15 = vand.u32 4294901760, %v1303_v46 }
 0x19e   :  { %v1315_v16 = vsub.f32 %v3159_v4, %v1314_v48 }
 0x19f   :  { %v3135_v51 = vpack.c.bf16 %v1170_v34, %v1166_v33  ;;  %v3139_v57 = vsub.f32 %v584_v56, %v1170_v34  ;;  %v1279_v62 = vsub.f32 %v3096_v26, %v1278_v45  ;;  %v1285_v56 = vsub.f32 %v3110_v32, %v1284_v2 }
 0x1a0   :  { %2627 = vmatpush1.bf16.msra.mxu1 %v3045_v13  ;;  %v586_v13 = vld [vmem:[#allocation6 + $0x60] sm:$0xff]  ;;  %v3180_v33 = vsub.f32 %v588_v38, %v1178_v55  ;;  %v1326_v38 = vand.u32 4294901760, %v3162_v10  ;;  %v1316_v46 = vand.u32 4294901760, %v1315_v16  ;;  %v2672_v16 = vpack.c.bf16 %v3162_v10, %v3159_v4 }
 0x1a1   :  { %2629 = vmatprep.subr.bf16.mxu1 %v3086_v18  ;;  %v1174_v54 = vand.u32 4294901760, %v586_v13  ;;  %v1280_v23 = vand.u32 4294901760, %v1279_v62  ;;  %v1308_v36 = vand.u32 4294901760, %v3139_v57  ;;  %v1286_v58 = vand.u32 4294901760, %v1285_v56 }
 0x1a3   :  { %1138 = vmatmul.mubr.f32.vlgmr.msra.gmra.mrb[0].mxu1 %v3060_v50  ;;  %v1255_v50 = vsub.f32 %v3081_v8, %v1254_v30  ;;  %v3164_v11 = vpack.c.bf16 %v1178_v55, %v1174_v54  ;;  %v3168_v53 = vsub.f32 %v586_v13, %v1174_v54  ;;  %v1291_v13 = vsub.f32 %v3118_v42, %v1290_v12 }
 0x1a4   :  { %2631 = vmatpush1.bf16.msra.mxu1 %v3094_v25  ;;  %1228 = vmatprep.mubr.f32.mxu1 %v2902_v1  ;;  %v2648_v54 = vpack.c.bf16 %v1280_v23, %v1268_v17  ;;  %v1274_v55 = vand.u32 4294901760, %v1273_v24  ;;  %v1309_v60 = vsub.f32 %v3139_v57, %v1308_v36  ;;  %v1327_v17 = vsub.f32 %v3162_v10, %v1326_v38 }
 0x1a5   :  { %2633 = vmatprep.subr.bf16.mxu1 %v3101_v9  ;;  %v1256_v6 = vand.u32 4294901760, %v1255_v50  ;;  %v1233_v50 = vand.u32 4294901760, %v1232_v22  ;;  %v1320_v62 = vand.u32 4294901760, %v3168_v53  ;;  %v1298_v23 = vand.u32 4294901760, %v1297_v59 }
 0x1a6   :  { %v2650_v22 = vpack.c.bf16 %v1286_v58, %v1274_v55  ;;  %v1310_v24 = vand.u32 4294901760, %v1309_v60  ;;  %v1328_v0 = vand.u32 4294901760, %v1327_v17  ;;  %v2660_v60 = vpack.c.bf16 %v3081_v8, %v3079_v7 }
 0x1a7   :  { %v2644_v34 = vpack.c.bf16 %v1256_v6, %v1244_v5  ;;  %v3369_v5 = vand.u32 4294901760, %v3180_v33  ;;  %v1292_v6 = vand.u32 4294901760, %v1291_v13  ;;  %v1321_v56 = vsub.f32 %v3168_v53, %v1320_v62 }
 0x1a8   :  { %2635 = vmatpush1.bf16.msra.mxu1 %v3103_v28  ;;  %v2656_v58 = vpack.c.bf16 %v1328_v0, %v1316_v46  ;;  %v2666_v0 = vpack.c.bf16 %v3110_v32, %v3108_v31  ;;  %v2692_v17 = vpack.c.bf16 %v1254_v30, %v1242_v29  ;;  %v2698_v7 = vpack.c.bf16 %v1284_v2, %v1272_v63  ;;  %v1811_v63 = vld [vmem:[%s3364_s5 + $0x10] sm:$0xff]  ;;  %v1812_v2 = vld [vmem:[%s3364_s5 + $0x18] sm:$0xff] }
 0x1a9   :  { %2637 = vmatprep.subr.bf16.mxu1 %v3112_v37  ;;  %v2652_v13 = vpack.c.bf16 %v1304_v15, %v1292_v6  ;;  %v1322_v55 = vand.u32 4294901760, %v1321_v56  ;;  %v2668_v6 = vpack.c.bf16 %v3120_v43, %v3118_v42  ;;  %v2670_v15 = vpack.c.bf16 %v3139_v57, %v3137_v52 }
 0x1aa   :  { %v2700_v8 = vpack.c.bf16 %v1302_v14, %v1290_v12  ;;  %v1838_v4 = vand.u32 4294901760, %v1812_v2  ;;  %v3371_v12 = vmov 0.0|0.0  }
 0x1ac   :  { %2639 = vmatpush1.bf16.msra.mxu1 %v3135_v51 }
 0x1ad   :  { %2641 = vmatprep.subr.bf16.mxu1 %v3157_v3 }
 0x1b0   :  { %2643 = vmatpush1.bf16.msra.mxu1 %v3164_v11 }
 0x1b1   :  { %2645 = vmatprep.subr.bf16.mxu1 %v2644_v34  ;;  %v1333_v34 = vsub.f32 %v3180_v33, %v3369_v5  ;;  %v2662_v5 = vpack.c.bf16 %v3090_v20, %v3088_v19  ;;  %v2702_v19 = vpack.c.bf16 %v1308_v36, %v1296_v35  ;;  %v2704_v20 = vpack.c.bf16 %v1326_v38, %v1314_v48  ;;  %v2320_v48 = vpop.permute.xlu1 %2319  ;;  %v1820_v38 = vpop.permute.xlu0 %1819 }
 0x1b3   :  { %1234 = vmatmul.mubr.f32.vlgmr.msra.gmra.mrb[0].mxu1 %v1233_v50  ;;  %v2654_v50 = vpack.c.bf16 %v1310_v24, %v1298_v23  ;;  %v2696_v23 = vpack.c.bf16 %v1278_v45, %v1266_v41 }
 0x1b4   :  { %2647 = vmatpush1.bf16.msra.mxu1 %v2646_v49  ;;  %1384 = vmatprep.mubr.f32.mxu1 %v2902_v1  ;;  %v1334_v49 = vand.u32 4294901760, %v1333_v34 }
 0x1b5   :  { %2649 = vmatprep.subr.bf16.mxu1 %v2648_v54  ;;  %v2664_v54 = vpack.c.bf16 %v3096_v26, %v3092_v21  ;;  %v3370_v21 = vand.u32 4294901760, %v3180_v33 }
 0x1b6   :  { %v2658_v59 = vpack.c.bf16 %v1334_v49, %v1322_v55 }
 0x1b7   :  { %v2706_v26 = vpack.c.bf16 %v3370_v21, %v1320_v62 }
 0x1b8   :  { %2651 = vmatpush1.bf16.msra.mxu1 %v2650_v22  ;;  %v2694_v22 = vpack.c.bf16 %v1260_v40, %v1248_v39 }
 0x1b9   :  { %2653 = vmatprep.subr.bf16.mxu1 %v2652_v13 }
 0x1bc   :  { %2655 = vmatpush1.bf16.msra.mxu1 %v2654_v50 }
 0x1bd   :  { %2657 = vmatprep.subr.bf16.mxu1 %v2656_v58 }
 0x1c0   :  { %2659 = vmatpush1.bf16.msra.mxu1 %v2658_v59 }
 0x1c1   :  { %2661 = vmatprep.subr.bf16.mxu1 %v2660_v60 }
 0x1c3   :  { %1386 = vmatmul.mubr.f32.vlgmr.msra.gmra.mrb[0].mxu1 %v3098_v27 }
 0x1c4   :  { %2663 = vmatpush1.bf16.msra.mxu1 %v2662_v5  ;;  %1488 = vmatprep.mubr.f32.mxu1 %v2902_v1  ;;  %v2674_v5 = vpack.c.bf16 %v3180_v33, %v3168_v53  ;;  %v1930_v33 = vsub.f32 %v1812_v2, %v1838_v4 }
 0x1c5   :  { %2665 = vmatprep.subr.bf16.mxu1 %v2664_v54 }
 0x1c6   :  { %v1931_v56 = vand.u32 4294901760, %v1930_v33 }
 0x1c8   :  { %2667 = vmatpush1.bf16.msra.mxu1 %v2666_v0  ;;  %v1932_v50 = vsub.f32 %v1930_v33, %v1931_v56 }
 0x1c9   :  { %2669 = vmatprep.subr.bf16.mxu1 %v2668_v6 }
 0x1ca   :  { %v1933_v60 = vand.u32 4294901760, %v1932_v50 }
 0x1cc   :  { %2671 = vmatpush1.bf16.msra.mxu1 %v2670_v15 }
 0x1cd   :  { %2673 = vmatprep.subr.bf16.mxu1 %v2672_v16 }
 0x1d0   :  { %2675 = vmatpush1.bf16.msra.mxu1 %v2674_v5 }
 0x1d1   :  { %2677 = vmatprep.subr.bf16.mxu1 %v3086_v18 }
 0x1d3   :  { %1491 = vmatmul.mubr.f32.vlgmr.msra.gmra.mrb[0].mxu1 %v3123_v44  ;;  %v1810_v44 = vld [vmem:[%s3364_s5 + $0x8] sm:$0xff] }
 0x1d4   :  { %2679 = vmatpush1.bf16.msra.mxu1 %v3094_v25  ;;  %1577 = vmatprep.mubr.f32.mxu1 %v2902_v1 }
 0x1d5   :  { %2681 = vmatprep.subr.bf16.mxu1 %v3101_v9 }
 0x1d8   :  { %2683 = vmatpush1.bf16.msra.mxu1 %v3103_v28 }
 0x1d9   :  { %2685 = vmatprep.subr.bf16.mxu1 %v3112_v37 }
 0x1dc   :  { %2687 = vmatpush1.bf16.msra.mxu1 %v3135_v51 }
 0x1dd   :  { %2689 = vmatprep.subr.bf16.mxu1 %v3157_v3 }
 0x1e0   :  { %2691 = vmatpush1.bf16.msra.mxu1 %v3164_v11 }
 0x1e1   :  { %2693 = vmatprep.subr.bf16.mxu1 %v2692_v17 }
 0x1e3   :  { %1581 = vmatmul.mubr.f32.vlgmr.msra.gmra.mrb[0].mxu1 %v1231_v61 }
 0x1e4   :  { %2695 = vmatpush1.bf16.msra.mxu1 %v2694_v22  ;;  %1699 = vmatprep.mubr.f32.mxu1 %v2902_v1 }
 0x1e5   :  { %2697 = vmatprep.subr.bf16.mxu1 %v2696_v23 }
 0x1e8   :  { %2699 = vmatpush1.bf16.msra.mxu1 %v2698_v7 }
 0x1e9   :  { %2701 = vmatprep.subr.bf16.mxu1 %v2700_v8 }
 0x1ec   :  { %2703 = vmatpush1.bf16.msra.mxu1 %v2702_v19 }
 0x1ed   :  { %2705 = vmatprep.subr.bf16.mxu1 %v2704_v20 }
 0x1f0   :  { %2707 = vmatpush1.bf16.msra.mxu1 %v2706_v26 }
 0x1f1   :  { %2709 = vmatprep.subr.bf16.mxu1 %v3086_v18  ;;  %v1797_v18 = vlaneseq }
 0x1f3   :  { %1701 = vmatmul.mubr.f32.vlgmr.msra.gmra.mrb[0].mxu1 %v3098_v27  ;;  %v1798_v29 = vshrl.u32 %v1797_v18, 7 }
 0x1f4   :  { %2711 = vmatpush1.bf16.msra.mxu1 %v3094_v25  ;;  %1787 = vmatprep.mubr.f32.mxu1 %v2902_v1  ;;  %v1795_v25 = vld [vmem:[%s3365_s6] sm:$0x3] }
 0x1f5   :  { %2713 = vmatprep.subr.bf16.mxu1 %v3101_v9  ;;  %v1803_v30 = vsub.s32 1, %v1798_v29  ;;  %v1799_v31 = vsub.s32 0, %v1798_v29 }
 0x1f7   :  { %v1804_v9 = vrot.slane %v1795_v25, %v1803_v30 }
 0x1f8   :  { %2715 = vmatpush1.bf16.msra.mxu1 %v3103_v28  ;;  %v1800_v28 = vrot.slane %v1795_v25, %v1799_v31 }
 0x1f9   :  { %2717 = vmatprep.subr.bf16.mxu1 %v3112_v37 }
 0x1fc   :  { %2719 = vmatpush1.bf16.msra.mxu1 %v3135_v51  ;;  %v1832_v51 = vand.u32 4294901760, %v1810_v44 }
 0x1fd   :  { %2721 = vmatprep.subr.bf16.mxu1 %v3157_v3  ;;  %v1835_v3 = vand.u32 4294901760, %v1811_v63 }
 0x1fe   :  { %v1916_v61 = vsub.f32 %v1810_v44, %v1832_v51 }
 0x1ff   :  { %v3310_v14 = vpack.c.bf16 %v1838_v4, %v1835_v3  ;;  %v1923_v53 = vsub.f32 %v1811_v63, %v1835_v3 }
 0x200   :  { %2723 = vmatpush1.bf16.msra.mxu1 %v3164_v11  ;;  %v1917_v11 = vand.u32 4294901760, %v1916_v61 }
 0x201   :  { %v1924_v24 = vand.u32 4294901760, %v1923_v53  ;;  %v2740_v6 = vpack.c.bf16 %v1930_v33, %v1923_v53 }
 0x202   :  { %v1918_v36 = vsub.f32 %v1916_v61, %v1917_v11 }
 0x203   :  { %1789 = vmatmul.mubr.f32.vlgmr.msra.gmra.mrb[0].mxu1 %v3098_v27  ;;  %v1809_v27 = vld [vmem:[%s3364_s5] sm:$0xff]  ;;  %v1925_v46 = vsub.f32 %v1923_v53, %v1924_v24  ;;  %s2905_s5 = smov 96   ;;  %v2752_v16 = vpack.c.bf16 %v1931_v56, %v1924_v24 }
 0x204   :  { %v1829_v45 = vand.u32 4294901760, %v1809_v27  ;;  %v1919_v34 = vand.u32 4294901760, %v1918_v36 }
 0x205   :  { %v1926_v59 = vand.u32 4294901760, %v1925_v46 }
 0x206   :  { %v3300_v52 = vpack.c.bf16 %v1832_v51, %v1829_v45  ;;  %v1909_v57 = vsub.f32 %v1809_v27, %v1829_v45 }
 0x207   :  { %v2734_v54 = vpack.c.bf16 %v1933_v60, %v1926_v59 }
 0x208   :  { %2726 = vmatpush3.bf16.msra.mxu0 %v3300_v52  ;;  %v1910_v10 = vand.u32 4294901760, %v1909_v57  ;;  %v2737_v0 = vpack.c.bf16 %v1916_v61, %v1909_v57 }
 0x209   :  { %2727 = vmatprep.subr.bf16.mxu0 %v3371_v12 }
 0x20a   :  { %v1911_v35 = vsub.f32 %v1909_v57, %v1910_v10  ;;  %v2749_v15 = vpack.c.bf16 %v1917_v11, %v1910_v10 }
 0x20c   :  { %2729 = vmatpush3.bf16.msra.mxu0 %v3310_v14  ;;  %v1912_v62 = vand.u32 4294901760, %v1911_v35 }
 0x20d   :  { %2730 = vmatprep.subr.bf16.mxu0 %v3371_v12 }
 0x20e   :  { %v2731_v58 = vpack.c.bf16 %v1919_v34, %v1912_v62 }
 0x2d6   :  { %v1790_v32 = vpop.f32.mrb[0].mxu1 }
 0x2d7   :  { %v1807_v37 = vadd.f32 %v1800_v28, %v1790_v32  ;;  %v1792_v39 = vpop.f32.mrb[1].mxu1 }
 0x2d8   :  { %v3292_v40 = vadd.f32 %v1804_v9, %v1792_v39 }
 0x2d9   :  { %v2351_v41 = vmul.f32 -1.442695, %v1807_v37 }
 0x2db   :  { %2815 = vpow2.f32 %v2351_v41 }
 0x2e5   :  { %v2816_v42 = vpop.eup %2815 }
 0x2e6   :  { %v1816_v43 = vadd.f32 1.0, %v2816_v42 }
 0x2e8   :  { %2817 = vrcp.f32 %v1816_v43 }
 0x2f2   :  { %v3314_v13 = vpop.eup %2817 }
 0x2f3   :  { %v2322_v55 = vmul.f32 %v3314_v13, %v2320_v48  ;;  %v1822_v49 = vmul.f32 %v3314_v13, %v1820_v38  ;;  %v2315_v18 = vsub.f32 1.0, %v3314_v13 }
 0x2f5   :  { %2324 = vrot.lane.b32.xlu1 %v2322_v55, %s2905_s5  ;;  %1824 = vrot.lane.b32.xlu0 %v1822_v49, %s2904_s19  ;;  %v2316_v25 = vmul.f32 %v2315_v18, %v3056_v47 }
 0x367   :  { %v1825_v5 = vpop.permute.xlu0 %1824  ;;  %v2325_v31 = vpop.permute.xlu1 %2324 }
 0x368   :  { %v1826_v17 = vsel %vm73_vm1, %v1825_v5, 0 }
 0x369   :  { %v1897_v22 = vand.u32 4294901760, %v1826_v17 }
 0x36b   :  { %v1898_v23 = vsub.f32 %v1826_v17, %v1897_v22 }
 0x36d   :  { %v1899_v7 = vand.u32 4294901760, %v1898_v23 }
 0x36f   :  { %v1900_v8 = vsub.f32 %v1898_v23, %v1899_v7 }
 0x371   :  { %v1901_v19 = vand.u32 4294901760, %v1900_v8 }
 0x373   :  { %2487 = vmatmul.mubr.f32.vlgmr.msra.gmra.mrb[2].mxu0 %v1901_v19 }
 0x374   :  { %2732 = vmatpush3.bf16.msra.mxu0 %v2731_v58  ;;  %2497 = vmatprep.mubr.msk.f32.mxu0 %vm2901_vm0, %v2902_v1 }
 0x375   :  { %2733 = vmatprep.subr.bf16.mxu0 %v3371_v12 }
 0x378   :  { %2735 = vmatpush3.bf16.msra.mxu0 %v2734_v54 }
 0x379   :  { %2736 = vmatprep.subr.bf16.mxu0 %v3371_v12 }
 0x37b   :  { %2498 = vmatmul.mubr.f32.vlgmr.msra.gmra.mrb[2].mxu0 %v1897_v22 }
 0x37c   :  { %2738 = vmatpush3.bf16.msra.mxu0 %v2737_v0  ;;  %2508 = vmatprep.mubr.msk.f32.mxu0 %vm2901_vm0, %v2902_v1 }
 0x37d   :  { %2739 = vmatprep.subr.bf16.mxu0 %v3371_v12 }
 0x380   :  { %2741 = vmatpush3.bf16.msra.mxu0 %v2740_v6 }
 0x381   :  { %2742 = vmatprep.subr.bf16.mxu0 %v3371_v12 }
 0x383   :  { %2509 = vmatmul.mubr.f32.vlgmr.msra.gmra.mrb[2].mxu0 %v1898_v23 }
 0x384   :  { %2744 = vmatpush3.bf16.msra.mxu0 %v3300_v52  ;;  %2519 = vmatprep.mubr.msk.f32.mxu0 %vm2901_vm0, %v2902_v1 }
 0x385   :  { %2745 = vmatprep.subr.bf16.mxu0 %v3371_v12 }
 0x388   :  { %2747 = vmatpush3.bf16.msra.mxu0 %v3310_v14 }
 0x389   :  { %2748 = vmatprep.subr.bf16.mxu0 %v3371_v12 }
 0x38b   :  { %2520 = vmatmul.mubr.f32.vlgmr.msra.gmra.mrb[2].mxu0 %v1899_v7 }
 0x38c   :  { %2750 = vmatpush3.bf16.msra.mxu0 %v2749_v15  ;;  %2530 = vmatprep.mubr.msk.f32.mxu0 %vm2901_vm0, %v2902_v1 }
 0x38d   :  { %2751 = vmatprep.subr.bf16.mxu0 %v3371_v12 }
 0x390   :  { %2753 = vmatpush3.bf16.msra.mxu0 %v2752_v16 }
 0x391   :  { %2754 = vmatprep.subr.bf16.mxu0 %v3371_v12 }
 0x393   :  { %2531 = vmatmul.mubr.f32.vlgmr.msra.gmra.mrb[2].mxu0 %v1897_v22 }
 0x394   :  { %2756 = vmatpush3.bf16.msra.mxu0 %v3300_v52  ;;  %2541 = vmatprep.mubr.msk.f32.mxu0 %vm2901_vm0, %v2902_v1 }
 0x395   :  { %2757 = vmatprep.subr.bf16.mxu0 %v3371_v12 }
 0x398   :  { %2759 = vmatpush3.bf16.msra.mxu0 %v3310_v14 }
 0x39b   :  { %2542 = vmatmul.mubr.f32.vlgmr.msra.gmra.mrb[2].mxu0 %v1897_v22 }
 0x46e   :  { %v2309_v20 = vpop.f32.mrb[2].mxu0 }
 0x46f   :  { %v2313_v21 = vadd.f32 %v2309_v20, %v3292_v40  ;;  %v2543_v26 = vpop.f32.mrb[3].mxu0 }
 0x471   :  { %2819 = vtanh.f32 %v2313_v21 }
 0x47b   :  { %v2820_v29 = vpop.eup %2819 }
 0x47c   :  { %v2317_v30 = vmul.f32 %v2820_v29, %v3314_v13 }
 0x47e   :  { %v2318_v9 = vadd.f32 %v2317_v30, %v2316_v25 }
 0x480   :  { %v2327_v1 = vadd.f32 %v2325_v31, %v2318_v9 }
 0x482   :  { %2821 = vtanh.f32 %v2327_v1 }
 0x48c   :  { %v2822_v28 = vpop.eup %2821 }
 0x48d   :  { %2330 = vrot.lane.b32.xlu0 %v2822_v28, %s2905_s5 }
 0x491   :  { %2340 = vrot.lane.b32.xlu0 %v2327_v1, %s2903_s18 }
 0x4ff   :  { %v2331_v32 = vpop.permute.xlu0 %2330 }
 0x500   :  { %v2333_v37 = vmul.f32 %v3314_v13, %v2331_v32 }
 0x502   :  { %2335 = vrot.lane.b32.xlu1 %v2333_v37, %s2903_s18 }
 0x503   :  { %v2341_v40 = vpop.permute.xlu0 %2340 }
 0x574   :  { %v2336_v39 = vpop.permute.xlu1 %2335 }
 0x575   :  { %2338 = vst.msk [vmem:[%s3366_s7] sm:$0xff] %vm73_vm1, %v2336_v39 }
 0x576   :  { %2344 = vst.msk [vmem:[%s3366_s7] sm:$0xff] %vm2343_vm3, %v2341_v40 }
 0x577   :  { %2349 = vsyncpa [#allocation3], 1 }
 0x578   :  { %2350 = vsyncpa [#allocation5], 1 }

</bundles_post_ra>
